<compile_context>
chip_gen: v7x
topology: tpu7x:2x2x1
jax: 0.10.0
libtpu: 0.0.40
codegen_flags: <defaults>
</compile_context>

<pallas_src>
import jax
import jax.numpy as jnp
from jax.experimental import pallas as pl
from jax.experimental.pallas import tpu as pltpu


def _timestep_embed_kernel(t_ref, w1_ref, b1_ref, w2_ref, b2_ref, o_ref):
    """Computes one (TB, TD) tile of  linear2(silu(linear1(t)))."""
    t = t_ref[...].astype(jnp.float32)                       # (TB, 1)
    # linear1 (1 -> H) is an outer product: broadcast on the VPU.
    h = t * w1_ref[...] + b1_ref[...]                        # (TB, H), f32
    h = h * jax.nn.sigmoid(h)                                # SiLU (sigmoid on EUP)
    # linear2 (H -> TD) on the MXU with f32 accumulation.
    acc = jnp.dot(h.astype(w2_ref.dtype), w2_ref[...],
                  preferred_element_type=jnp.float32)        # (TB, TD)
    o_ref[...] = (acc + b2_ref[...].astype(jnp.float32)).astype(o_ref.dtype)


def _choose_tile(dim: int, preferred: int, align: int) -> int:
    """Largest tile <= `preferred` that is a multiple of `align` and divides `dim`;
    falls back to the full dim (always a legal BlockSpec size)."""
    if dim <= preferred:
        return dim
    t = (preferred // align) * align
    while t >= align:
        if dim % t == 0:
            return t
        t -= align
    return dim


def timestep_embedding_forward(t, w1, b1, w2, b2):
    """
    t : (B,)                  timesteps
    w1: (H, 1),  b1: (H,)     linear1 params (H = d_model // 4)
    w2: (D, H),  b2: (D,)     linear2 params (D = d_model)
    returns (B, D)
    """
    B = t.shape[0]
    H = w1.shape[0]
    D = w2.shape[0]

    # Layout plumbing (outside the hot loop; pure metadata / one-time transpose).
    t_col = t.astype(jnp.float32).reshape(B, 1)              # (B, 1)
    w1_row = w1.reshape(1, H).astype(jnp.float32)            # W1^T as a single row
    b1_row = b1.reshape(1, H).astype(jnp.float32)
    w2_t = jnp.transpose(w2)                                 # (H, D), lane-dense on D
    b2_row = b2.reshape(1, D)

    out_dtype = w2.dtype

    tb = _choose_tile(B, 256, 8)       # batch tile  (sublane axis)
    td = _choose_tile(D, 512, 128)     # feature tile (lane axis, 128-dense when D large)
    grid = (pl.cdiv(B, tb), pl.cdiv(D, td))

    return pl.pallas_call(
        _timestep_embed_kernel,
        out_shape=jax.ShapeDtypeStruct((B, D), out_dtype),
        grid_spec=pltpu.PrefetchScalarGridSpec(
            num_scalar_prefetch=0,
            grid=grid,
            in_specs=[
                pl.BlockSpec((tb, 1), lambda i, j: (i, 0)),    # t column
                pl.BlockSpec((1, H), lambda i, j: (0, 0)),     # w1 row (broadcast)
                pl.BlockSpec((1, H), lambda i, j: (0, 0)),     # b1 row
                pl.BlockSpec((H, td), lambda i, j: (0, j)),    # W2^T tile
                pl.BlockSpec((1, td), lambda i, j: (0, j)),    # b2 tile
            ],
            out_specs=pl.BlockSpec((tb, td), lambda i, j: (i, j)),
        ),
        compiler_params=pltpu.CompilerParams(
            dimension_semantics=("parallel", "parallel"),
        ),
    )(t_col, w1_row, b1_row, w2_t, b2_row)


if __name__ == "__main__":
    # Small shapes consistent with the module: batch=8, d_model=32 -> hidden = 8.
    B = 8
    D_MODEL = 32
    H = D_MODEL // 4

    key = jax.random.PRNGKey(0)
    k_t, k_w1, k_b1, k_w2, k_b2 = jax.random.split(key, 5)

    t = jax.random.uniform(k_t, (B,), dtype=jnp.float32) * 1000.0   # timesteps
    w1 = jax.random.normal(k_w1, (H, 1), dtype=jnp.float32) * 0.5   # linear1.weight
    b1 = jax.random.normal(k_b1, (H,), dtype=jnp.float32) * 0.1     # linear1.bias
    w2 = jax.random.normal(k_w2, (D_MODEL, H), dtype=jnp.float32) * 0.5  # linear2.weight
    b2 = jax.random.normal(k_b2, (D_MODEL,), dtype=jnp.float32) * 0.1    # linear2.bias

    out = timestep_embedding_forward(t, w1, b1, w2, b2)
    out = jax.block_until_ready(out)

    # Pure-JAX reference (mirrors the PyTorch forward exactly).
    t_col = t.astype(jnp.float32)[:, None]                 # (B, 1)
    h_ref = t_col @ w1.T + b1[None, :]                     # linear1
    h_ref = h_ref * jax.nn.sigmoid(h_ref)                  # SiLU
    ref = h_ref @ w2.T + b2[None, :]                       # linear2

    assert out.shape == (B, D_MODEL)
    assert jnp.allclose(out, ref, atol=1e-5, rtol=1e-5), "mismatch vs reference"

    print("KERNEL_OK")
</pallas_src>

<mosaic_0001>
module attributes {stable_mosaic.version = 11 : i64} {
  func.func @_timestep_embed_kernel(%arg0: i32, %arg1: i32, %arg2: memref<8x1xf32, #tpu.memory_space<vmem>>, %arg3: memref<1x8xf32, #tpu.memory_space<vmem>>, %arg4: memref<1x8xf32, #tpu.memory_space<vmem>>, %arg5: memref<8x32xf32, #tpu.memory_space<vmem>>, %arg6: memref<1x32xf32, #tpu.memory_space<vmem>>, %arg7: memref<8x32xf32, #tpu.memory_space<vmem>>) attributes {dimension_semantics = [#tpu.dimension_semantics<parallel>, #tpu.dimension_semantics<parallel>], iteration_bounds = array<i64: 1, 1>, scalar_prefetch = 0 : i64, scratch_operands = 0 : i64, tpu.core_type = #tpu.core_type<tc>, window_params = [{transform_indices = @transform_0, window_bounds = array<i64: 8, 1>}, {pipeline_mode = #tpu.pipeline_mode<synchronous>, transform_indices = @transform_1, window_bounds = array<i64: 1, 8>}, {pipeline_mode = #tpu.pipeline_mode<synchronous>, transform_indices = @transform_2, window_bounds = array<i64: 1, 8>}, {transform_indices = @transform_3, window_bounds = array<i64: 8, 32>}, {transform_indices = @transform_4, window_bounds = array<i64: 1, 32>}, {transform_indices = @transform_5, window_bounds = array<i64: 8, 32>}]} {
    %c0 = arith.constant 0 : index
    %c0_0 = arith.constant 0 : index
    %0 = vector.load %arg2[%c0, %c0_0] : memref<8x1xf32, #tpu.memory_space<vmem>>, vector<8x1xf32>
    %c0_1 = arith.constant 0 : index
    %c0_2 = arith.constant 0 : index
    %1 = vector.load %arg3[%c0_1, %c0_2] : memref<1x8xf32, #tpu.memory_space<vmem>>, vector<1x8xf32>
    %2 = vector.broadcast %0 : vector<8x1xf32> to vector<8x8xf32>
    %3 = vector.broadcast %1 : vector<1x8xf32> to vector<8x8xf32>
    %4 = arith.mulf %2, %3 : vector<8x8xf32>
    %c0_3 = arith.constant 0 : index
    %c0_4 = arith.constant 0 : index
    %5 = vector.load %arg4[%c0_3, %c0_4] : memref<1x8xf32, #tpu.memory_space<vmem>>, vector<1x8xf32>
    %6 = vector.broadcast %5 : vector<1x8xf32> to vector<8x8xf32>
    %7 = arith.addf %4, %6 : vector<8x8xf32>
    %8 = arith.negf %7 : vector<8x8xf32>
    %9 = math.exp %8 : vector<8x8xf32>
    %cst = arith.constant 1.000000e+00 : f32
    %10 = vector.broadcast %cst : f32 to vector<8x8xf32>
    %11 = arith.addf %10, %9 : vector<8x8xf32>
    %12 = arith.divf %10, %11 : vector<8x8xf32>
    %13 = arith.mulf %7, %12 : vector<8x8xf32>
    %c0_5 = arith.constant 0 : index
    %c0_6 = arith.constant 0 : index
    %14 = vector.load %arg5[%c0_5, %c0_6] : memref<8x32xf32, #tpu.memory_space<vmem>>, vector<8x32xf32>
    %cst_7 = arith.constant dense<0.000000e+00> : vector<8x32xf32>
    %15 = tpu.matmul %13, %14, %cst_7 {dimension_numbers = #tpu.dot_dimension_numbers<[1], [0], [0], [1], [0, 0, 1, 1], [], []>} : vector<8x8xf32>, vector<8x32xf32>, vector<8x32xf32> -> vector<8x32xf32>
    %c0_8 = arith.constant 0 : index
    %c0_9 = arith.constant 0 : index
    %16 = vector.load %arg6[%c0_8, %c0_9] : memref<1x32xf32, #tpu.memory_space<vmem>>, vector<1x32xf32>
    %17 = vector.broadcast %16 : vector<1x32xf32> to vector<8x32xf32>
    %18 = arith.addf %15, %17 : vector<8x32xf32>
    %c0_10 = arith.constant 0 : index
    %c0_11 = arith.constant 0 : index
    %19 = vector.load %arg7[%c0_10, %c0_11] : memref<8x32xf32, #tpu.memory_space<vmem>>, vector<8x32xf32>
    tpu.vector_store %arg7[%c0_10, %c0_11], %18 {strides = array<i32>} : memref<8x32xf32, #tpu.memory_space<vmem>>, vector<8x32xf32>,
    return
  }
  func.func @transform_0(%arg0: i32, %arg1: i32) -> (i32, i32) {
    %c0_i32 = arith.constant 0 : i32
    %c0_i32_0 = arith.constant 0 : i32
    return %arg0, %c0_i32 : i32, i32
  }
  func.func @transform_1(%arg0: i32, %arg1: i32) -> (i32, i32) {
    %c0_i32 = arith.constant 0 : i32
    %c0_i32_0 = arith.constant 0 : i32
    %c0_i32_1 = arith.constant 0 : i32
    return %c0_i32, %c0_i32_0 : i32, i32
  }
  func.func @transform_2(%arg0: i32, %arg1: i32) -> (i32, i32) {
    %c0_i32 = arith.constant 0 : i32
    %c0_i32_0 = arith.constant 0 : i32
    %c0_i32_1 = arith.constant 0 : i32
    return %c0_i32, %c0_i32_0 : i32, i32
  }
  func.func @transform_3(%arg0: i32, %arg1: i32) -> (i32, i32) {
    %c0_i32 = arith.constant 0 : i32
    %c0_i32_0 = arith.constant 0 : i32
    return %c0_i32, %arg1 : i32, i32
  }
  func.func @transform_4(%arg0: i32, %arg1: i32) -> (i32, i32) {
    %c0_i32 = arith.constant 0 : i32
    %c0_i32_0 = arith.constant 0 : i32
    return %c0_i32, %arg1 : i32, i32
  }
  func.func @transform_5(%arg0: i32, %arg1: i32) -> (i32, i32) {
    %c0_i32 = arith.constant 0 : i32
    return %arg0, %arg1 : i32, i32
  }
}

</mosaic_0001>

<bundles_post_ra>
// kernel: tpu_custom_call.1
= control target key start
LH: loop header
LB: loop body
LE: loop exit
PB: predicated region body
PF: predicated region fallthrough
CT: control target
= control target key end

     0   :  { %v193_v1 = vmov 0   ;;  %s254_s0 = inlined_call_operand.vmem [shape: f32[8,1], index: 0, kind: input, shape index: {}]   ;;  %s255_s1 = inlined_call_operand.vmem [shape: f32[1,8], index: 1, kind: input, shape index: {}]   ;;  %s256_s2 = inlined_call_operand.vmem [shape: f32[1,8], index: 2, kind: input, shape index: {}]   ;;  %s257_s3 = inlined_call_operand.vmem [shape: f32[8,32], index: 3, kind: input, shape index: {}]   ;;  %s258_s4 = inlined_call_operand.vmem [shape: f32[1,32], index: 4, kind: input, shape index: {}]   ;;  %s259_s5 = inlined_call_operand.hbm [shape: f32[8,32], index: 5, kind: output, shape index: {}]  }
   0x1   :  { %v21_v0 = vld [vmem:[%s254_s0] sm:$0xff]  ;;  %164 = vset.pattern.permute.xlu0 %v193_v1 }
   0x2   :  { %10 = vsyncpa [#allocation3], 0  ;;  %25 = vperm.xlu0 %164, %v21_v0   ;;  %v194_v2 = vmov 0.0   ;;  %v50_v3 = vld [vmem:[%s257_s3] sm:$0xff]  ;;  %vm195_vm0 = vmmov 0   ;;  %vm58_vm1 = vcmask 64512  }
   0x3   :  { %155 = vmatprep.subr.mxu0 %v194_v2  ;;  %157 = vmatprep.mubr.msk.f32.mxu0 %vm195_vm0, %v194_v2  ;;  %v148_v4 = vld [vmem:[%s255_s1] ss:$0 sm:$0xff]  ;;  %s196_s1 = smov [#allocation2]   ;;  %vm132_vm2 = vcmask 261120  }
   0x4   :  { %156 = vmatpush3.msra.mxu0 %v50_v3  ;;  %v149_v5 = vld [vmem:[%s256_s2] ss:$0 sm:$0xff]  ;;  %s140_s26 = sshll.u32 %s196_s1, 4  ;;  %s141_s26 = int_to_ptr.vmem [resolvable:$true] %s140_s26 }
   0x5   :  { %v151_v14 = vld [vmem:[%s258_s4] ss:$0 sm:$0xff]  ;;  %s169_s2 = scalar_lea.vmem %s141_s26, 128  ;;  %p174_p1 = scmp.lt.s32.totalorder %s141_s26, %s141_s26 }
   0x6   :  { %p170_p0 = scmp.ne.s32.totalorder %s141_s26, %s169_s2  ;;  %p175_p2 = scmp.lt.s32.totalorder %s169_s2, %s169_s2 }
   0x8   :  { %p176_p3 = por %p175_p2, %p174_p1 }
   0xa   :  { %p177_p4 = pnand %p176_p3, %p170_p0 }
  0x81   :  { %v26_v6 = vpop.permute.xlu0 %25 }
  0x82   :  { %v34_v7 = vmul.f32 %v148_v4, %v26_v6 }
  0x84   :  { %v42_v8 = vadd.f32 %v149_v5, %v34_v7 }
  0x86   :  { %v150_v9 = vmul.f32 -1.442695, %v42_v8 }
  0x88   :  { %165 = vpow2.f32 %v150_v9 }
  0x92   :  { %v166_v10 = vpop.eup %165 }
  0x93   :  { %v46_v11 = vadd.f32 1.0, %v166_v10 }
  0x95   :  { %167 = vrcp.f32 %v46_v11 }
  0x9f   :  { %v168_v12 = vpop.eup %167 }
  0xa0   :  { %v49_v13 = vmul.f32 %v168_v12, %v42_v8 }
  0xa2   :  { %158 = vmatmul.mubr.msk.f32.vlgmr.msra.gmra.mrb[0].mxu0 %vm58_vm1, %v49_v13 }
 0x175   :  { %v128_v15 = vpop.f32.mrb[0].mxu0 }
 0x176   :  { %v129_v16 = vadd.f32 %v151_v14, %v128_v15  ;;  %v159_v17 = vpop.f32.mrb[1].mxu0 }
 0x178   :  { %133 = vst.msk [vmem:[#allocation2] sm:$0xff] %vm132_vm2, %v129_v16 }
 0x179   :  { %180 = shalt.err (!%p177_p4)
}
 0x17a   :  { %s181_s29 = scalar_lea.hbm %s259_s5, 128 }
 0x17b   :  { %p182_p5 = scmp.ne.s32.totalorder %s259_s5, %s181_s29  ;;  %p185_p6 = scmp.lt.u32.totalorder %s181_s29, %s259_s5 }
 0x17d   :  { %p187_p7 = pnand %p185_p6, %p182_p5 }
 0x17f   :  { %190 = shalt.err (!%p187_p7)
}
 0x180   :  { %143 = dma.vmem_to_hbm [thread:$0]  %s141_s26, 128, %s259_s5, [#allocation3]  }
 0x181   :  { %191 = dma.done.wait [#allocation3], 128  }
 0x182   :  { %192 = vsyncadd [#allocation3], 4294967168 }
 0x183   :  { %147 = vsyncpa [#allocation3], 1 }

</bundles_post_ra>
